<compile_context>
chip_gen: v6e
topology: v6e:2x2x1
jax: 0.10.0
libtpu: 0.0.40
codegen_flags: <defaults>
</compile_context>

<pallas_src>
import functools
import math

import jax
import jax.numpy as jnp
from jax.experimental import pallas as pl
from jax.experimental.pallas import tpu as pltpu

LANES = 128
MAX_TILE_ROWS = 8192          # 8192 x 128 x 4B = 4 MiB per f32 input per step
TARGET_TILE_BYTES = 4 << 20   # target bytes per input per grid step
SMOOTH = 1.0


def _sublane_multiple(dtype) -> int:
    """Minimum sublane tile multiple: (8,128) f32, (16,128) bf16, (32,128) int8/fp8."""
    bits = jnp.dtype(dtype).itemsize * 8
    if bits >= 32:
        return 8
    if bits == 16:
        return 16
    return 32


@functools.lru_cache(maxsize=None)
def _num_tensorcores() -> int:
    """How many TensorCores to split the reduction across.

    1 on single-TC chips (v5e / v6e) so no extra padded tile / duplicated
    epilogue is paid; 2 on megacore / dual-TC chips (v4 / v5p / v7x).
    Correctness does not depend on getting this right.
    """
    try:
        info = pltpu.get_tpu_info()
        for name in ("num_cores", "num_cores_per_chip", "core_count",
                     "tensorcore_count"):
            val = getattr(info, name, None)
            if val:
                return max(1, min(2, int(val)))
    except Exception:
        pass
    try:
        kind = jax.devices()[0].device_kind.lower()
    except Exception:
        return 1
    if "lite" in kind or "v5e" in kind or "v6e" in kind:
        return 1
    if "v4" in kind or "v5p" in kind or "v7" in kind:
        return 2
    return 1


def _make_dice_kernel(*, rows, tile_rows, acc_rows, tiles_per_core, needs_mask):
    groups = tile_rows // acc_rows

    def kernel(p_ref, t_ref, out_ref, acc_i_ref, acc_s_ref):
        i = pl.program_id(1)

        @pl.when(i == 0)
        def _init():
            acc_i_ref[...] = jnp.zeros_like(acc_i_ref)
            acc_s_ref[...] = jnp.zeros_like(acc_s_ref)

        p = p_ref[...].astype(jnp.float32)
        t = t_ref[...].astype(jnp.float32)

        def accumulate(pv, tv):
            # Pure element-wise VPU work folded into small (acc_rows, 128)
            # accumulators; hides entirely under the input DMA.
            if groups == 1:
                acc_i_ref[...] += pv * tv
                acc_s_ref[...] += pv + tv
            else:
                acc_i_ref[...] += jnp.sum(
                    (pv * tv).reshape(groups, acc_rows, LANES), axis=0)
                acc_s_ref[...] += jnp.sum(
                    (pv + tv).reshape(groups, acc_rows, LANES), axis=0)

        if not needs_mask:
            accumulate(p, t)
        else:
            c = pl.program_id(0)
            base_row = (c * tiles_per_core + i) * tile_rows
            is_full = (base_row + tile_rows) <= rows

            @pl.when(is_full)
            def _interior():                       # common path: no mask cost
                accumulate(p, t)

            @pl.when(jnp.logical_not(is_full))
            def _tail():                           # boundary / over-range tile
                row_ids = base_row + jax.lax.broadcasted_iota(
                    jnp.int32, (tile_rows, LANES), 0)
                valid = row_ids < rows
                accumulate(jnp.where(valid, p, 0.0),
                           jnp.where(valid, t, 0.0))

        @pl.when(i == pl.num_programs(1) - 1)
        def _finalize():
            # One small cross-sublane reduce per accumulator, per core.
            inter = jnp.sum(acc_i_ref[...], axis=0, keepdims=True)
            total = jnp.sum(acc_s_ref[...], axis=0, keepdims=True)
            out_ref[0:1, 0:1, :] = inter.reshape(1, 1, LANES)
            out_ref[0:1, 1:2, :] = total.reshape(1, 1, LANES)

    return kernel


def dice_loss(preds, y_true, *, force_tile_rows=None):
    assert preds.shape == y_true.shape
    n = int(math.prod(preds.shape)) if preds.shape else 1
    rows = -(-n // LANES)                                   # ceil(n / 128)

    isz_p = jnp.dtype(preds.dtype).itemsize
    isz_t = jnp.dtype(y_true.dtype).itemsize
    sub = max(_sublane_multiple(preds.dtype), _sublane_multiple(y_true.dtype))

    # Dtype-aware row-tile cap (>= TARGET_TILE_BYTES per input per grid step,
    # hard-capped so f32 temporaries stay comfortably inside VMEM).
    if force_tile_rows is not None:
        cap_rows = int(force_tile_rows)                     # test hook
    else:
        cap_rows = TARGET_TILE_BYTES // (LANES * max(isz_p, isz_t))
        cap_rows = min(MAX_TILE_ROWS, cap_rows)
        cap_rows = max(sub, (cap_rows // sub) * sub)

    if rows <= cap_rows:
        tile_rows = rows          # single full-array block (full dim allowed)
        acc_rows = rows
    else:
        tile_rows = cap_rows      # multiple of `sub` (and of 8)
        acc_rows = 8

    tiles = -(-rows // tile_rows)
    num_cores = max(1, min(_num_tensorcores(), tiles))
    tiles_per_core = -(-tiles // num_cores)
    covered_rows = num_cores * tiles_per_core * tile_rows
    needs_mask = covered_rows != rows
    needs_clamp = num_cores * tiles_per_core > tiles

    # Lane-align the flat view.  Metadata-only reshape when numel % 128 == 0;
    # otherwise a single small zero-pad copy is unavoidable for a rectangular
    # (rows, 128) view.
    # TODO(synk): a manual-DMA (memory_space=pl.ANY) path could avoid even this
    # copy for lane-misaligned element counts.
    def prep(x):
        x = jnp.ravel(x)
        if rows * LANES != n:
            x = jnp.pad(x, (0, rows * LANES - n))
        return x.reshape(rows, LANES)

    p2 = prep(preds)
    t2 = prep(y_true)

    last_block = tiles - 1

    def in_index_map(c, i):
        blk = c * tiles_per_core + i
        if needs_clamp:
            # Over-range tiles re-read the last valid block; their contribution
            # is zeroed by the in-kernel mask.
            blk = jnp.minimum(blk, last_block)
        return (blk, 0)

    kernel = _make_dice_kernel(rows=rows, tile_rows=tile_rows,
                               acc_rows=acc_rows, tiles_per_core=tiles_per_core,
                               needs_mask=needs_mask)

    in_spec = pl.BlockSpec((tile_rows, LANES), in_index_map)
    out_spec = pl.BlockSpec((1, 2, LANES), lambda c, i: (c, 0, 0))

    tile_in_bytes = tile_rows * LANES * (isz_p + isz_t)
    vmem_limit = int(min(
        64 * 1024 * 1024,
        max(32 * 1024 * 1024,
            2 * tile_in_bytes                    # double-buffered input tiles
            + 4 * tile_rows * LANES * 4          # f32 element-wise temporaries
            + (4 << 20))))                       # accumulators / output / slack

    cost = pl.CostEstimate(
        flops=4 * n,
        transcendentals=0,
        bytes_accessed=n * (isz_p + isz_t) + num_cores * 2 * LANES * 4)

    parts = pl.pallas_call(
        kernel,
        out_shape=jax.ShapeDtypeStruct((num_cores, 2, LANES), jnp.float32),
        grid_spec=pltpu.PrefetchScalarGridSpec(
            num_scalar_prefetch=0,
            grid=(num_cores, tiles_per_core),
            in_specs=[in_spec, in_spec],
            out_specs=out_spec,
            scratch_shapes=[
                pltpu.VMEM((acc_rows, LANES), jnp.float32),
                pltpu.VMEM((acc_rows, LANES), jnp.float32),
            ],
        ),
        compiler_params=pltpu.CompilerParams(
            dimension_semantics=("parallel", "arbitrary"),
            vmem_limit_bytes=vmem_limit,
        ),
        cost_estimate=cost,
    )(p2, t2)

    # Trivial combine of the per-core / per-lane partials + dice formula.
    intersection = jnp.sum(parts[:, 0, :])
    total = jnp.sum(parts[:, 1, :])
    dsc = (2.0 * intersection + SMOOTH) / (total + SMOOTH)
    return 1.0 - dsc


def dice_loss_ref(preds, y_true):
    iflat = jnp.ravel(preds).astype(jnp.float32)
    tflat = jnp.ravel(y_true).astype(jnp.float32)
    intersection = jnp.dot(iflat, tflat)
    dsc = (2.0 * intersection + 1.0) / (jnp.sum(iflat) + jnp.sum(tflat) + 1.0)
    return 1.0 - dsc


if __name__ == "__main__":
    key = jax.random.PRNGKey(0)
    k1, k2 = jax.random.split(key)

    # Small shapes consistent with a segmentation output: NCHW (2, 4, 16, 16).
    preds = jax.nn.sigmoid(jax.random.normal(k1, (2, 4, 16, 16), jnp.float32))
    y_true = (jax.random.uniform(k2, (2, 4, 16, 16)) > 0.5).astype(jnp.float32)

    loss = jax.block_until_ready(dice_loss(preds, y_true))
    ref = dice_loss_ref(preds, y_true)
    assert jnp.allclose(loss, ref, rtol=1e-5, atol=1e-5), (loss, ref)

    # Second check: lane-misaligned numel + forced tiny tiles so the in-kernel
    # tail-mask path (partial / over-range tiles) is exercised.
    k3, k4 = jax.random.split(k1)
    preds2 = jax.nn.sigmoid(jax.random.normal(k3, (2, 3, 16, 17), jnp.float32))
    y_true2 = (jax.random.uniform(k4, (2, 3, 16, 17)) > 0.5).astype(jnp.float32)
    loss2 = jax.block_until_ready(dice_loss(preds2, y_true2, force_tile_rows=8))
    ref2 = dice_loss_ref(preds2, y_true2)
    assert jnp.allclose(loss2, ref2, rtol=1e-5, atol=1e-5), (loss2, ref2)

    print("KERNEL_OK")
</pallas_src>

<mosaic_0001>
module attributes {stable_mosaic.version = 11 : i64} {
  func.func @kernel(%arg0: i32, %arg1: i32, %arg2: memref<16x128xf32, #tpu.memory_space<vmem>>, %arg3: memref<16x128xf32, #tpu.memory_space<vmem>>, %arg4: memref<1x2x128xf32, #tpu.memory_space<vmem>>, %arg5: memref<16x128xf32, #tpu.memory_space<vmem>>, %arg6: memref<16x128xf32, #tpu.memory_space<vmem>>) attributes {dimension_semantics = [#tpu.dimension_semantics<parallel>, #tpu.dimension_semantics<arbitrary>], iteration_bounds = array<i64: 1, 1>, scalar_prefetch = 0 : i64, scratch_operands = 2 : i64, tpu.core_type = #tpu.core_type<tc>, window_params = [{transform_indices = @transform_0, window_bounds = array<i64: 16, 128>}, {transform_indices = @transform_1, window_bounds = array<i64: 16, 128>}, {transform_indices = @transform_2, window_bounds = array<i64: 1, 2, 128>}]} {
    %c0_i32 = arith.constant 0 : i32
    %0 = arith.cmpi eq, %arg1, %c0_i32 : i32
    %1 = arith.extui %0 : i1 to i32
    %c0_i32_0 = arith.constant 0 : i32
    %2 = arith.cmpi ne, %1, %c0_i32_0 : i32
    scf.if %2 {
      %cst = arith.constant 0.000000e+00 : f32
      %16 = vector.broadcast %cst : f32 to vector<16x128xf32>
      %c0_14 = arith.constant 0 : index
      %c0_15 = arith.constant 0 : index
      %17 = vector.load %arg5[%c0_14, %c0_15] : memref<16x128xf32, #tpu.memory_space<vmem>>, vector<16x128xf32>
      tpu.vector_store %arg5[%c0_14, %c0_15], %16 {strides = array<i32>} : memref<16x128xf32, #tpu.memory_space<vmem>>, vector<16x128xf32>,
      %cst_16 = arith.constant 0.000000e+00 : f32
      %18 = vector.broadcast %cst_16 : f32 to vector<16x128xf32>
      %c0_17 = arith.constant 0 : index
      %c0_18 = arith.constant 0 : index
      %19 = vector.load %arg6[%c0_17, %c0_18] : memref<16x128xf32, #tpu.memory_space<vmem>>, vector<16x128xf32>
      tpu.vector_store %arg6[%c0_17, %c0_18], %18 {strides = array<i32>} : memref<16x128xf32, #tpu.memory_space<vmem>>, vector<16x128xf32>,
    } else {
    }
    %c0 = arith.constant 0 : index
    %c0_1 = arith.constant 0 : index
    %3 = vector.load %arg2[%c0, %c0_1] : memref<16x128xf32, #tpu.memory_space<vmem>>, vector<16x128xf32>
    %c0_2 = arith.constant 0 : index
    %c0_3 = arith.constant 0 : index
    %4 = vector.load %arg3[%c0_2, %c0_3] : memref<16x128xf32, #tpu.memory_space<vmem>>, vector<16x128xf32>
    %c0_4 = arith.constant 0 : index
    %c0_5 = arith.constant 0 : index
    %5 = vector.load %arg5[%c0_4, %c0_5] : memref<16x128xf32, #tpu.memory_space<vmem>>, vector<16x128xf32>
    %6 = arith.mulf %3, %4 : vector<16x128xf32>
    %7 = arith.addf %5, %6 : vector<16x128xf32>
    %c0_6 = arith.constant 0 : index
    %c0_7 = arith.constant 0 : index
    %8 = vector.load %arg5[%c0_6, %c0_7] : memref<16x128xf32, #tpu.memory_space<vmem>>, vector<16x128xf32>
    tpu.vector_store %arg5[%c0_6, %c0_7], %7 {strides = array<i32>} : memref<16x128xf32, #tpu.memory_space<vmem>>, vector<16x128xf32>,
    %c0_8 = arith.constant 0 : index
    %c0_9 = arith.constant 0 : index
    %9 = vector.load %arg6[%c0_8, %c0_9] : memref<16x128xf32, #tpu.memory_space<vmem>>, vector<16x128xf32>
    %10 = arith.addf %3, %4 : vector<16x128xf32>
    %11 = arith.addf %9, %10 : vector<16x128xf32>
    %c0_10 = arith.constant 0 : index
    %c0_11 = arith.constant 0 : index
    %12 = vector.load %arg6[%c0_10, %c0_11] : memref<16x128xf32, #tpu.memory_space<vmem>>, vector<16x128xf32>
    tpu.vector_store %arg6[%c0_10, %c0_11], %11 {strides = array<i32>} : memref<16x128xf32, #tpu.memory_space<vmem>>, vector<16x128xf32>,
    %c0_i32_12 = arith.constant 0 : i32
    %13 = arith.cmpi eq, %arg1, %c0_i32_12 : i32
    %14 = arith.extui %13 : i1 to i32
    %c0_i32_13 = arith.constant 0 : i32
    %15 = arith.cmpi ne, %14, %c0_i32_13 : i32
    scf.if %15 {
      %c0_14 = arith.constant 0 : index
      %c0_15 = arith.constant 0 : index
      %16 = vector.load %arg5[%c0_14, %c0_15] : memref<16x128xf32, #tpu.memory_space<vmem>>, vector<16x128xf32>
      %cst = arith.constant dense<0.000000e+00> : vector<128xf32>
      %17 = vector.multi_reduction <add>, %16, %cst [0] : vector<16x128xf32> to vector<128xf32>
      %18 = vector.shape_cast %17 : vector<128xf32> to vector<1x128xf32>
      %c0_16 = arith.constant 0 : index
      %c0_17 = arith.constant 0 : index
      %19 = vector.load %arg6[%c0_16, %c0_17] : memref<16x128xf32, #tpu.memory_space<vmem>>, vector<16x128xf32>
      %cst_18 = arith.constant dense<0.000000e+00> : vector<128xf32>
      %20 = vector.multi_reduction <add>, %19, %cst_18 [0] : vector<16x128xf32> to vector<128xf32>
      %21 = vector.shape_cast %20 : vector<128xf32> to vector<1x128xf32>
      %22 = vector.shape_cast %18 : vector<1x128xf32> to vector<1x1x128xf32>
      %c0_19 = arith.constant 0 : index
      %c0_20 = arith.constant 0 : index
      %c0_21 = arith.constant 0 : index
      %23 = vector.load %arg4[%c0_19, %c0_20, %c0_21] : memref<1x2x128xf32, #tpu.memory_space<vmem>>, vector<1x1x128xf32>
      tpu.vector_store %arg4[%c0_19, %c0_20, %c0_21], %22 {strides = array<i32>} : memref<1x2x128xf32, #tpu.memory_space<vmem>>, vector<1x1x128xf32>,
      %24 = vector.shape_cast %21 : vector<1x128xf32> to vector<1x1x128xf32>
      %c0_22 = arith.constant 0 : index
      %c1 = arith.constant 1 : index
      %c0_23 = arith.constant 0 : index
      %25 = vector.load %arg4[%c0_22, %c1, %c0_23] : memref<1x2x128xf32, #tpu.memory_space<vmem>>, vector<1x1x128xf32>
      tpu.vector_store %arg4[%c0_22, %c1, %c0_23], %24 {strides = array<i32>} : memref<1x2x128xf32, #tpu.memory_space<vmem>>, vector<1x1x128xf32>,
    } else {
    }
    return
  }
  func.func @transform_0(%arg0: i32, %arg1: i32) -> (i32, i32) {
    %c1_i32 = arith.constant 1 : i32
    %0 = arith.muli %arg0, %c1_i32 : i32
    %1 = arith.addi %0, %arg1 : i32
    %c0_i32 = arith.constant 0 : i32
    %c0_i32_0 = arith.constant 0 : i32
    return %1, %c0_i32 : i32, i32
  }
  func.func @transform_1(%arg0: i32, %arg1: i32) -> (i32, i32) {
    %c1_i32 = arith.constant 1 : i32
    %0 = arith.muli %arg0, %c1_i32 : i32
    %1 = arith.addi %0, %arg1 : i32
    %c0_i32 = arith.constant 0 : i32
    %c0_i32_0 = arith.constant 0 : i32
    return %1, %c0_i32 : i32, i32
  }
  func.func @transform_2(%arg0: i32, %arg1: i32) -> (i32, i32, i32) {
    %c0_i32 = arith.constant 0 : i32
    %c0_i32_0 = arith.constant 0 : i32
    %c0_i32_1 = arith.constant 0 : i32
    return %arg0, %c0_i32, %c0_i32_0 : i32, i32, i32
  }
}

</mosaic_0001>

<bundles_post_ra>
// kernel: tpu_custom_call.1
= control target key start
LH: loop header
LB: loop body
LE: loop exit
PB: predicated region body
PF: predicated region fallthrough
CT: control target
= control target key end

     0   :  { %7 = vsyncpa [#allocation5], 0  ;;  %s219_s0 = inlined_call_operand.hbm [shape: f32[16,128], index: 0, kind: input, shape index: {}]   ;;  %s220_s1 = inlined_call_operand.hbm [shape: f32[16,128], index: 1, kind: input, shape index: {}]   ;;  %s221_s2 = inlined_call_operand.hbm [shape: f32[1,2,128], index: 2, kind: output, shape index: {}]  }
   0x1   :  { %8 = vsyncpa [#allocation8], 0 }
   0x2   :  { %9 = vsyncpa [#allocation6], 0  ;;  %s190_s9 = smov [#allocation4]  }
   0x3   :  { %s19_s10 = sshll.u32 %s190_s9, 4  ;;  %s20_s10 = int_to_ptr.vmem [resolvable:$true] %s19_s10 }
   0x4   :  { %s132_s11 = scalar_lea.vmem %s20_s10, 256  ;;  %p137_p1 = scmp.lt.s32.totalorder %s20_s10, %s20_s10 }
   0x5   :  { %p133_p0 = scmp.ne.s32.totalorder %s20_s10, %s132_s11  ;;  %p138_p2 = scmp.lt.s32.totalorder %s132_s11, %s132_s11 }
   0x7   :  { %p139_p3 = por %p138_p2, %p137_p1 }
   0x9   :  { %p140_p4 = pnand %p139_p3, %p133_p0 }
   0xb   :  { %143 = shalt.err (!%p140_p4)
}
   0xc   :  { %s191_s12 = smov 128   ;;  %s192_s13 = smov 8  }
   0xd   :  { %25 = dma.hbm_to_vmem [thread:$0]  %s219_s0, 256, %s20_s10, [#allocation5], %s191_s12, %s191_s12, %s192_s13  }
   0xe   :  { %s193_s16 = smov [#allocation7]  }
   0xf   :  { %s35_s17 = sshll.u32 %s193_s16, 4  ;;  %s36_s17 = int_to_ptr.vmem [resolvable:$true] %s35_s17 }
  0x10   :  { %s152_s18 = scalar_lea.vmem %s36_s17, 256  ;;  %p157_p6 = scmp.lt.s32.totalorder %s36_s17, %s36_s17 }
  0x11   :  { %p153_p5 = scmp.ne.s32.totalorder %s36_s17, %s152_s18  ;;  %p158_p7 = scmp.lt.s32.totalorder %s152_s18, %s152_s18 }
  0x13   :  { %p159_p8 = por %p158_p7, %p157_p6 }
  0x15   :  { %p160_p9 = pnand %p159_p8, %p153_p5 }
  0x17   :  { %163 = shalt.err (!%p160_p9)
}
  0x18   :  { %41 = dma.hbm_to_vmem [thread:$0]  %s220_s1, 256, %s36_s17, [#allocation8], %s191_s12, %s191_s12, %s192_s13  }
  0x19   :  { %184 = dma.done.wait [#allocation5], 256  }
  0x1a   :  { %185 = vsyncadd [#allocation5], 4294967040 }
  0x1b   :  { %186 = dma.done.wait [#allocation8], 256  }
  0x1c   :  { %187 = vsyncadd [#allocation8], 4294967040  ;;  %v60_v0 = vld [vmem:[#allocation4] sm:$0xff]  ;;  %v61_v1 = vld [vmem:[#allocation4 + $0x8] sm:$0xff]  ;;  %s194_s0 = smov [#allocation9]  }
  0x1d   :  { %v62_v2 = vld [vmem:[#allocation7] sm:$0xff]  ;;  %v63_v3 = vld [vmem:[#allocation7 + $0x8] sm:$0xff]  ;;  %s109_s1 = sshll.u32 %s194_s0, 4  ;;  %s110_s1 = int_to_ptr.vmem [resolvable:$true] %s109_s1 }
  0x1e   :  { %v66_v4 = vmul.f32 %v62_v2, %v60_v0  ;;  %v74_v5 = vadd.f32 %v62_v2, %v60_v0  ;;  %v67_v6 = vmul.f32 %v63_v3, %v61_v1  ;;  %v75_v7 = vadd.f32 %v63_v3, %v61_v1  ;;  %s164_s21 = scalar_lea.vmem %s110_s1, 32  ;;  %p169_p11 = scmp.lt.s32.totalorder %s110_s1, %s110_s1 }
  0x1f   :  { %p165_p10 = scmp.ne.s32.totalorder %s110_s1, %s164_s21  ;;  %p170_p12 = scmp.lt.s32.totalorder %s164_s21, %s164_s21 }
  0x20   :  { %v85_v8 = vadd.f32 %v67_v6, %v66_v4  ;;  %v94_v9 = vadd.f32 %v75_v7, %v74_v5 }
  0x21   :  { %p171_p13 = por %p170_p12, %p169_p11 }
  0x22   :  { %v86_v10 = vrot.slane %v85_v8, 4  ;;  %v95_v11 = vrot.slane %v94_v9, 4 }
  0x23   :  { %p172_p0 = pnand %p171_p13, %p165_p10 }
  0x24   :  { %v87_v12 = vadd.f32 %v86_v10, %v85_v8  ;;  %v96_v13 = vadd.f32 %v95_v11, %v94_v9 }
  0x26   :  { %v88_v14 = vrot.slane %v87_v12, 2  ;;  %v97_v15 = vrot.slane %v96_v13, 2 }
  0x28   :  { %v89_v16 = vadd.f32 %v88_v14, %v87_v12  ;;  %v98_v17 = vadd.f32 %v97_v15, %v96_v13 }
  0x2a   :  { %v90_v18 = vrot.slane %v89_v16, 1  ;;  %v99_v19 = vrot.slane %v98_v17, 1 }
  0x2c   :  { %v91_v20 = vadd.f32 %v90_v18, %v89_v16  ;;  %v100_v21 = vadd.f32 %v99_v19, %v98_v17 }
  0x2e   :  { %101 = vst [vmem:[#allocation9] sm:$0x1] %v91_v20  ;;  %102 = vst [vmem:[#allocation9 + $0x1] sm:$0x1] %v100_v21 }
  0x2f   :  { %175 = shalt.err (!%p172_p0)
}
  0x30   :  { %112 = dma.vmem_to_hbm [thread:$0]  %s110_s1, 32, %s221_s2, [#allocation6]  }
  0x31   :  { %188 = dma.done.wait [#allocation6], 32  }
  0x32   :  { %189 = vsyncadd [#allocation6], 4294967264 }
  0x33   :  { %116 = vsyncpa [#allocation5], 1 }
  0x34   :  { %117 = vsyncpa [#allocation8], 1 }
  0x35   :  { %118 = vsyncpa [#allocation6], 1 }

</bundles_post_ra>
